<compile_context>
chip_gen: v7x
topology: tpu7x:2x2x1
jax: 0.10.0
libtpu: 0.0.40
codegen_flags: <defaults>
</compile_context>

<pallas_src>
import functools

import jax
import jax.numpy as jnp
from jax.experimental import pallas as pl
from jax.experimental.pallas import tpu as pltpu


def _dhead_kernel(x_ref, w_ref, b_ref, o_ref):
    # x_ref: (nb, C, tile_hw)  -- C on sublanes, spatial on lanes (native NCHW slice)
    # w_ref: (C, 1)            -- conv weight; broadcasts over batch & lanes
    # b_ref: (1,)              -- scalar bias in SMEM
    # o_ref: (nb, 1, tile_hw)  -- lane-dense output tile
    x = x_ref[...]
    w = w_ref[...]            # (C, 1)
    b = b_ref[0]
    # 1x1 conv with out_channels=1 == weighted reduction over C.  Keep it on
    # the VPU/XLU (full f32): the M=1 MXU path can never be efficient here.
    s = jnp.sum(x * w, axis=1, keepdims=True) + b       # (nb, 1, tile_hw)
    o_ref[...] = jax.nn.sigmoid(s).astype(o_ref.dtype)


@functools.partial(jax.jit, static_argnames=("target_block_bytes",))
def dhead_forward(x_nchw, weight, bias, target_block_bytes=8 * 1024 * 1024):
    """Forward pass of DHead.

    x_nchw: (N, C, H, W) float32
    weight: (1, C, 1, 1) float32   (nn.Conv2d(C, 1, 1) weight)
    bias:   (1,) float32
    returns: squeeze(sigmoid(conv1x1(x)))   (torch .squeeze() semantics)
    """
    N, C, H, W = x_nchw.shape
    HW = H * W

    # Free view of the native NCHW layout -- no transpose, no HBM copy.
    x3 = x_nchw.reshape(N, C, HW).astype(jnp.float32)

    itemsize = 4
    # Spatial tile: a multiple of 128 lanes, sized for ~target_block_bytes of
    # input per grid step, capped at the 128-rounded full spatial extent.
    hw_lanes = pl.cdiv(HW, 128) * 128
    tile_hw = max(128, (target_block_bytes // (C * itemsize)) // 128 * 128)
    tile_hw = min(tile_hw, hw_lanes)
    n_hw_tiles = pl.cdiv(HW, tile_hw)   # ragged last tile handled by Pallas

    # Batch blocking: if one spatial tile already covers the whole image and
    # the per-batch block is small, fold several batches into each grid step
    # so we don't pay the per-step overhead on tiny DMAs.
    nb = 1
    if n_hw_tiles == 1:
        per_batch = C * tile_hw * itemsize
        nb = int(min(N, max(1, target_block_bytes // max(per_batch, 1))))
        while N % nb != 0:     # keep blocks exactly covering the batch axis
            nb -= 1
    n_b_tiles = N // nb if n_hw_tiles == 1 else N

    w2d = weight.reshape(C, 1).astype(jnp.float32)   # C on sublanes, matches x tile
    b1d = bias.reshape(1).astype(jnp.float32)

    out = pl.pallas_call(
        _dhead_kernel,
        out_shape=jax.ShapeDtypeStruct((N, 1, HW), jnp.float32),
        grid_spec=pltpu.PrefetchScalarGridSpec(
            num_scalar_prefetch=0,
            grid=(n_b_tiles, n_hw_tiles),
            in_specs=[
                pl.BlockSpec((nb, C, tile_hw), lambda n, j: (n, 0, j)),
                pl.BlockSpec((C, 1), lambda n, j: (0, 0)),
                pl.BlockSpec(memory_space=pltpu.MemorySpace.SMEM),
            ],
            out_specs=pl.BlockSpec((nb, 1, tile_hw), lambda n, j: (n, 0, j)),
        ),
        compiler_params=pltpu.CompilerParams(
            # Fully data-parallel grid (no cross-step accumulation).
            dimension_semantics=("parallel", "parallel"),
            # Double-buffered ~8 MiB input tiles + tiny output: 40 MiB keeps
            # headroom on v5e/v6e (128 MiB) and stays under v7x's 64 MiB/TC.
            vmem_limit_bytes=40 * 1024 * 1024,
        ),
    )(x3, w2d, b1d)

    out = out.reshape(N, 1, H, W)
    # torch's .squeeze() removes all size-1 dims.
    return jnp.squeeze(out)


if __name__ == "__main__":
    key = jax.random.PRNGKey(0)
    kx, kw, kb = jax.random.split(key, 3)

    # Small shapes consistent with the module (input_channels scaled down).
    N, C, H, W = 2, 4, 16, 16
    x = jax.random.normal(kx, (N, C, H, W), dtype=jnp.float32)

    # Deterministic parameter init (synthetic, mimics Conv2d(C, 1, 1) shapes).
    fan_in = C  # kernel is 1x1
    bound = 1.0 / (fan_in ** 0.5)
    weight = jax.random.uniform(kw, (1, C, 1, 1), jnp.float32, -bound, bound)
    bias = jax.random.uniform(kb, (1,), jnp.float32, -bound, bound)

    out = dhead_forward(x, weight, bias)
    out = jax.block_until_ready(out)

    # Reference check in plain JAX (same math, no Pallas).
    ref = jax.nn.sigmoid(
        jnp.einsum("nchw,c->nhw", x, weight.reshape(C)) + bias[0]
    )
    assert out.shape == (N, H, W), out.shape
    assert jnp.allclose(out, ref, atol=1e-4, rtol=1e-4), float(
        jnp.max(jnp.abs(out - ref))
    )

    print("KERNEL_OK")
</pallas_src>

<mosaic_0001>
module attributes {stable_mosaic.version = 11 : i64} {
  func.func @_dhead_kernel(%arg0: i32, %arg1: i32, %arg2: memref<2x4x256xf32, #tpu.memory_space<vmem>>, %arg3: memref<4x1xf32, #tpu.memory_space<vmem>>, %arg4: memref<1xf32, #tpu.memory_space<smem>>, %arg5: memref<2x1x256xf32, #tpu.memory_space<vmem>>) attributes {dimension_semantics = [#tpu.dimension_semantics<parallel>, #tpu.dimension_semantics<parallel>], iteration_bounds = array<i64: 1, 1>, scalar_prefetch = 0 : i64, scratch_operands = 0 : i64, tpu.core_type = #tpu.core_type<tc>, window_params = [{transform_indices = @transform_0, window_bounds = array<i64: 2, 4, 256>}, {pipeline_mode = #tpu.pipeline_mode<synchronous>, transform_indices = @transform_1, window_bounds = array<i64: 4, 1>}, {transform_indices = @transform_2, window_bounds = array<i64: 1>}, {transform_indices = @transform_3, window_bounds = array<i64: 2, 1, 256>}]} {
    %c0 = arith.constant 0 : index
    %c0_0 = arith.constant 0 : index
    %c0_1 = arith.constant 0 : index
    %0 = vector.load %arg2[%c0, %c0_0, %c0_1] : memref<2x4x256xf32, #tpu.memory_space<vmem>>, vector<2x4x256xf32>
    %c0_2 = arith.constant 0 : index
    %c0_3 = arith.constant 0 : index
    %1 = vector.load %arg3[%c0_2, %c0_3] : memref<4x1xf32, #tpu.memory_space<vmem>>, vector<4x1xf32>
    %c0_4 = arith.constant 0 : index
    %2 = memref.load %arg4[%c0_4] : memref<1xf32, #tpu.memory_space<smem>>
    %3 = vector.shape_cast %1 : vector<4x1xf32> to vector<1x4x1xf32>
    %4 = vector.broadcast %3 : vector<1x4x1xf32> to vector<2x4x256xf32>
    %5 = arith.mulf %0, %4 : vector<2x4x256xf32>
    %cst = arith.constant dense<0.000000e+00> : vector<2x256xf32>
    %6 = vector.multi_reduction <add>, %5, %cst [1] : vector<2x4x256xf32> to vector<2x256xf32>
    %7 = vector.shape_cast %6 : vector<2x256xf32> to vector<2x1x256xf32>
    %8 = vector.broadcast %2 : f32 to vector<2x1x256xf32>
    %9 = arith.addf %7, %8 : vector<2x1x256xf32>
    %10 = arith.negf %9 : vector<2x1x256xf32>
    %11 = math.exp %10 : vector<2x1x256xf32>
    %cst_5 = arith.constant 1.000000e+00 : f32
    %12 = vector.broadcast %cst_5 : f32 to vector<2x1x256xf32>
    %13 = arith.addf %12, %11 : vector<2x1x256xf32>
    %14 = arith.divf %12, %13 : vector<2x1x256xf32>
    %c0_6 = arith.constant 0 : index
    %c0_7 = arith.constant 0 : index
    %c0_8 = arith.constant 0 : index
    %15 = vector.load %arg5[%c0_6, %c0_7, %c0_8] : memref<2x1x256xf32, #tpu.memory_space<vmem>>, vector<2x1x256xf32>
    tpu.vector_store %arg5[%c0_6, %c0_7, %c0_8], %14 {strides = array<i32>} : memref<2x1x256xf32, #tpu.memory_space<vmem>>, vector<2x1x256xf32>,
    return
  }
  func.func @transform_0(%arg0: i32, %arg1: i32) -> (i32, i32, i32) {
    %c0_i32 = arith.constant 0 : i32
    %c0_i32_0 = arith.constant 0 : i32
    return %arg0, %c0_i32, %arg1 : i32, i32, i32
  }
  func.func @transform_1(%arg0: i32, %arg1: i32) -> (i32, i32) {
    %c0_i32 = arith.constant 0 : i32
    %c0_i32_0 = arith.constant 0 : i32
    %c0_i32_1 = arith.constant 0 : i32
    return %c0_i32, %c0_i32_0 : i32, i32
  }
  func.func @transform_2(%arg0: i32, %arg1: i32) -> i32 {
    %c0_i32 = arith.constant 0 : i32
    %c0_i32_0 = arith.constant 0 : i32
    return %c0_i32 : i32
  }
  func.func @transform_3(%arg0: i32, %arg1: i32) -> (i32, i32, i32) {
    %c0_i32 = arith.constant 0 : i32
    %c0_i32_0 = arith.constant 0 : i32
    return %arg0, %c0_i32, %arg1 : i32, i32, i32
  }
}

</mosaic_0001>

<bundles_post_ra>
// kernel: dhead_forward.1
= control target key start
LH: loop header
LB: loop body
LE: loop exit
PB: predicated region body
PF: predicated region fallthrough
CT: control target
= control target key end

     0   :  { %v167_v0 = vmov 0   ;;  %v168_v2 = vmov 839922192   ;;  %v26_v4 = vlaneseq  ;;  %vm39_vm0 = vcmask 1043456   ;;  %s214_s1 = inlined_call_operand.vmem [shape: f32[4,1], index: 1, kind: input, shape index: {}]   ;;  %s215_s0 = inlined_call_operand.vmem [shape: f32[2,4,256], index: 0, kind: input, shape index: {}]   ;;  %s216_s2 = inlined_call_operand.<no memory space> [shape: f32[1], index: 2, kind: input, shape index: {}]   ;;  %s217_s3 = inlined_call_operand.vmem [shape: f32[2,1,256], index: 3, kind: output, shape index: {}]  }
   0x1   :  { %150 = vset.pattern.permute.xlu0 %v167_v0  ;;  %v17_v1 = vld [vmem:[%s214_s1] sm:$0xf]  ;;  %v24_v3 = vunpack.c.l.s4 %v168_v2  ;;  %v16_v10 = vld [vmem:[%s215_s0 + $0x8] sm:$0xff]  ;;  %v68_v38 = vstv %s216_s2  ;;  %v169_v61 = vmov 1966171168  }
   0x2   :  { %21 = vperm.xlu0 %150, %v17_v1   ;;  %v194_v6 = vshrl.u32 %v26_v4, 7  ;;  %v15_v9 = vld [vmem:[%s215_s0] sm:$0xff]  ;;  %v103_v62 = vunpack.c.l.s4 %v169_v61  ;;  %vm135_vm1 = vcmp.lt.s32.totalorder %v26_v4, 256 }
   0x3   :  { %v25_v5 = vunpack.c.0.s8 %v24_v3 }
   0x4   :  { %v104_v63 = vunpack.c.0.s8 %v103_v62 }
   0x5   :  { %v28_v7 = vsub.s32 %v25_v5, %v194_v6 }
   0x6   :  { %v107_v2 = vsub.s32 %v104_v63, %v194_v6 }
  0x81   :  { %v22_v8 = vpop.permute.xlu0 %21 }
  0x82   :  { %v29_v11 = vrot.slane %v22_v8, %v28_v7 }
  0x84   :  { %v31_v12 = vmul.f32 %v29_v11, %v15_v9  ;;  %v32_v13 = vmul.f32 %v29_v11, %v16_v10 }
  0x86   :  { %v35_v14 = vcombine.high %v31_v12, %v31_v12  ;;  %v36_v15 = vcombine.high %v32_v13, %v32_v13  ;;  %v40_v16 = vsel %vm39_vm0, %v31_v12, 0.0  ;;  %v54_v17 = vsel %vm39_vm0, %v32_v13, 0.0 }
  0x87   :  { %v41_v18 = vrot.slane %v40_v16, 4  ;;  %v55_v19 = vrot.slane %v54_v17, 4 }
  0x88   :  { %v47_v20 = vsel %vm39_vm0, %v35_v14, 0.0  ;;  %v61_v21 = vsel %vm39_vm0, %v36_v15, 0.0 }
  0x89   :  { %v42_v22 = vadd.f32 %v41_v18, %v40_v16  ;;  %v48_v23 = vrot.slane %v47_v20, 4  ;;  %v56_v24 = vadd.f32 %v55_v19, %v54_v17  ;;  %v62_v25 = vrot.slane %v61_v21, 4 }
  0x8b   :  { %v43_v26 = vrot.slane %v42_v22, 2  ;;  %v49_v27 = vadd.f32 %v48_v23, %v47_v20  ;;  %v57_v28 = vrot.slane %v56_v24, 2  ;;  %v63_v29 = vadd.f32 %v62_v25, %v61_v21 }
  0x8d   :  { %v44_v30 = vadd.f32 %v43_v26, %v42_v22  ;;  %v50_v31 = vrot.slane %v49_v27, 2  ;;  %v58_v32 = vadd.f32 %v57_v28, %v56_v24  ;;  %v64_v33 = vrot.slane %v63_v29, 2 }
  0x8f   :  { %v45_v34 = vrot.slane %v44_v30, 1  ;;  %v51_v35 = vadd.f32 %v50_v31, %v49_v27  ;;  %v59_v36 = vrot.slane %v58_v32, 1  ;;  %v65_v37 = vadd.f32 %v64_v33, %v63_v29 }
  0x91   :  { %v46_v39 = vadd.f32 %v45_v34, %v44_v30  ;;  %v52_v40 = vrot.slane %v51_v35, 1  ;;  %v60_v41 = vadd.f32 %v59_v36, %v58_v32  ;;  %v66_v42 = vrot.slane %v65_v37, 1 }
  0x93   :  { %v53_v43 = vadd.f32 %v52_v40, %v51_v35  ;;  %v67_v44 = vadd.f32 %v66_v42, %v65_v37  ;;  %v69_v45 = vadd.f32 %v68_v38, %v46_v39  ;;  %v71_v46 = vadd.f32 %v68_v38, %v60_v41 }
  0x95   :  { %v70_v47 = vadd.f32 %v68_v38, %v53_v43  ;;  %v72_v48 = vadd.f32 %v68_v38, %v67_v44  ;;  %v143_v49 = vmul.f32 -1.442695, %v69_v45  ;;  %v145_v50 = vmul.f32 -1.442695, %v71_v46 }
  0x97   :  { %151 = vpow2.f32 %v143_v49  ;;  %v144_v51 = vmul.f32 -1.442695, %v70_v47  ;;  %v146_v52 = vmul.f32 -1.442695, %v72_v48 }
  0x98   :  { %153 = vpow2.f32 %v145_v50 }
  0x99   :  { %155 = vpow2.f32 %v144_v51 }
  0x9a   :  { %157 = vpow2.f32 %v146_v52 }
  0xa1   :  { %v152_v53 = vpop.eup %151 }
  0xa2   :  { %v154_v54 = vpop.eup %153  ;;  %v85_v55 = vadd.f32 1.0, %v152_v53 }
  0xa3   :  { %v156_v56 = vpop.eup %155  ;;  %v87_v57 = vadd.f32 1.0, %v154_v54 }
  0xa4   :  { %v158_v58 = vpop.eup %157  ;;  %v86_v59 = vadd.f32 1.0, %v156_v56  ;;  %159 = vrcp.f32 %v85_v55 }
  0xa5   :  { %v88_v60 = vadd.f32 1.0, %v158_v58  ;;  %161 = vrcp.f32 %v87_v57 }
  0xa6   :  { %163 = vrcp.f32 %v86_v59 }
  0xa7   :  { %165 = vrcp.f32 %v88_v60 }
  0xae   :  { %v160_v0 = vpop.eup %159 }
  0xaf   :  { %v162_v1 = vpop.eup %161 }
  0xb0   :  { %v164_v3 = vpop.eup %163 }
  0xb1   :  { %v166_v5 = vpop.eup %165  ;;  %v101_v7 = vcombine.low %v160_v0, %v164_v3 }
  0xb2   :  { %v116_v8 = vcombine.low %v162_v1, %v166_v5 }
  0xb3   :  { %v108_v9 = vrot.slane %v101_v7, %v107_v2 }
  0xb4   :  { %v123_v10 = vrot.slane %v116_v8, %v107_v2 }
  0xb5   :  { %v115_v11 = vrot.slane %v108_v9, %v107_v2 }
  0xb6   :  { %v130_v12 = vrot.slane %v123_v10, %v107_v2 }
  0xb7   :  { %137 = vst.msk [vmem:[%s217_s3] sm:$0x3] %vm135_vm1, %v115_v11 }
  0xb8   :  { %138 = vst.msk [vmem:[%s217_s3 + $0x2] sm:$0x3] %vm135_vm1, %v130_v12 }

</bundles_post_ra>
